<compile_context>
chip_gen: v7x
topology: tpu7x:2x2x1
jax: 0.10.0
libtpu: 0.0.40
codegen_flags: <defaults>
</compile_context>

<pallas_src>
import math

import jax
import jax.numpy as jnp
from jax.experimental import pallas as pl
from jax.experimental.pallas import tpu as pltpu

_ALIGN = 16  # sublane-tile safe for both f32 (8) and bf16 (16) x inputs


def _mlp_kernel(x_ref, w1_ref, b1_ref, w2_ref, b2_ref, w3_ref, b3_ref, o_ref):
    # Layer 1: bf16 MXU matmul with f32 accumulation; bias + relu in f32 (VPU).
    x = x_ref[...]
    if x.dtype != jnp.bfloat16:          # only cast when the producer sent f32
        x = x.astype(jnp.bfloat16)       # (tb, 128)
    h1 = jnp.dot(x, w1_ref[...], preferred_element_type=jnp.float32) + b1_ref[...]
    h1 = jnp.maximum(h1, 0.0)            # (tb, 256) f32

    # Layer 2: hidden-10 dim zero-padded to 128 lanes (padded cols stay exactly
    # 0 through bias+relu). Kept on the MXU: 128 lanes is the minimum N and the
    # VPU alternative costs 10-20x more VALU cycles.
    h2 = jnp.dot(h1.astype(jnp.bfloat16), w2_ref[...],
                 preferred_element_type=jnp.float32) + b2_ref[...]
    h2 = jnp.maximum(h2, 0.0)            # (tb, 128) f32

    # Layer 3 (10 -> 1): off the MXU. VPU multiply + XLU lane reduction, scalar
    # bias read from SMEM. Padded w3 entries are zero -> numerically exact.
    z = jnp.sum(h2 * w3_ref[...], axis=-1, keepdims=True) + b3_ref[0, 0]  # (tb, 1)

    # Exact, numerically stable sigmoid (tile x 1 volume -> essentially free).
    z = jnp.clip(z, -30.0, 30.0)
    o_ref[...] = 1.0 / (1.0 + jnp.exp(-z))


def _round_up(n, m):
    return ((n + m - 1) // m) * m


def _num_tensorcores():
    """Best-effort TensorCore-per-chip count; falls back to 1 (never raises)."""
    try:
        info = pltpu.get_tpu_info()
        for name in ("num_cores", "cores_per_chip", "num_tensorcores",
                     "tensorcores_per_chip", "core_count"):
            v = getattr(info, name, None)
            if isinstance(v, int) and v > 0:
                return v
    except Exception:
        pass
    return 1


def prepare_params(raw_params):
    """Convert raw f32 [in, out] params into the kernel layout.

    - W1, W2 cast to bf16 for the MXU (f32 accumulation in-kernel).
    - W2 / b2 / w3 lane-padded from 10 to 128 (zero fill -> numerically exact).
    - w3 stored as a [1, 128] row for the VPU multiply + lane reduction.
    - b3 stored as a (1, 1) f32 scalar for SMEM.
    """
    w1, b1, w2, b2, w3, b3 = raw_params
    w1b = w1.astype(jnp.bfloat16)                                          # (128, 256)
    w2p = jnp.zeros((256, 128), jnp.float32).at[:, :10].set(w2).astype(jnp.bfloat16)
    b2p = jnp.zeros((1, 128), jnp.float32).at[:, :10].set(b2)
    w3p = jnp.zeros((1, 128), jnp.float32).at[:, :10].set(w3.reshape(1, 10))
    b3s = jnp.asarray(b3, jnp.float32).reshape(1, 1)
    return (w1b, b1, w2p, b2p, w3p, b3s)


def sonde_net_forward(x, params, *, tb=2048):
    """x: [B, 128] float32 or bfloat16. params from prepare_params().

    Returns [B, 1] float32. Prefer feeding x already in bfloat16 (upstream
    producer) on mem-bound parts; the kernel casts to bf16 for the MXU anyway.
    """
    w1, b1, w2, b2, w3, b3 = params
    B, Din = x.shape
    assert Din == 128

    # Batch tile: as large as possible to amortize the ~0.35us per-step
    # pipeline overhead (tb=2048 ~ 7 MiB of in-kernel f32 intermediates, well
    # under every generation's default scoped-VMEM limit; cap v5e sweeps at
    # 2048 or raise vmem_limit_bytes before going to 4096).
    n_tc = _num_tensorcores()
    tile = min(_round_up(tb, _ALIGN), _round_up(B, _ALIGN))
    if n_tc >= 2 and B > _ALIGN:
        # Megacore parts only: keep >= 1 step per core (ideally >= 2 per core
        # so each core's x DMA stays double-buffered) when the batch allows.
        want = 2 * n_tc if B >= 2 * n_tc * _ALIGN else n_tc
        if pl.cdiv(B, tile) < want:
            tile = _round_up(pl.cdiv(B, want), _ALIGN)

    Bp = _round_up(B, tile)
    if Bp != B:
        x = jnp.pad(x, ((0, Bp - B), (0, 0)))      # handle any batch size

    grid = (Bp // tile,)
    const = lambda i: (0, 0)                       # weights: same block every step

    x_bytes = jnp.dtype(x.dtype).itemsize
    weight_bytes = (128 * 256 * 2 + 256 * 4 + 256 * 128 * 2 + 128 * 4 + 128 * 4 + 4)
    cost = pl.CostEstimate(
        flops=2 * Bp * (128 * 256 + 256 * 128),
        transcendentals=Bp,
        bytes_accessed=Bp * (128 * x_bytes + 4) + weight_bytes,
    )

    out = pl.pallas_call(
        _mlp_kernel,
        out_shape=jax.ShapeDtypeStruct((Bp, 1), jnp.float32),
        grid_spec=pltpu.PrefetchScalarGridSpec(
            num_scalar_prefetch=0,
            grid=grid,
            in_specs=[
                pl.BlockSpec((tile, 128), lambda i: (i, 0)),          # x tile
                pl.BlockSpec((128, 256), const),                      # W1 (bf16)
                pl.BlockSpec((1, 256), const),                        # b1 (f32)
                pl.BlockSpec((256, 128), const),                      # W2 padded (bf16)
                pl.BlockSpec((1, 128), const),                        # b2 padded (f32)
                pl.BlockSpec((1, 128), const),                        # w3 row padded (f32)
                pl.BlockSpec(memory_space=pltpu.MemorySpace.SMEM),    # b3 scalar
            ],
            out_specs=pl.BlockSpec((tile, 1), lambda i: (i, 0)),
        ),
        compiler_params=pltpu.CompilerParams(
            dimension_semantics=("parallel",),
        ),
        cost_estimate=cost,
    )(x, w1, b1, w2, b2, w3, b3)

    return out[:B]


def init_params(key):
    """Deterministic init mimicking nn.Linear's U(-1/sqrt(fan_in), 1/sqrt(fan_in)).

    Weights stored as [in, out] (transposed vs. PyTorch) so the kernel computes
    y = x @ W + b, identical math to x @ W_pt.T + b.
    """
    def linear(key, fan_in, fan_out):
        kw, kb = jax.random.split(key)
        bound = 1.0 / math.sqrt(fan_in)
        w = jax.random.uniform(kw, (fan_in, fan_out), jnp.float32, -bound, bound)
        b = jax.random.uniform(kb, (1, fan_out), jnp.float32, -bound, bound)
        return w, b

    k1, k2, k3 = jax.random.split(key, 3)
    w1, b1 = linear(k1, 128, 256)
    w2, b2 = linear(k2, 256, 10)
    w3, b3 = linear(k3, 10, 1)
    return (w1, b1, w2, b2, w3, b3)


def _reference(x, raw_params):
    w1, b1, w2, b2, w3, b3 = raw_params
    h1 = jax.nn.relu(x @ w1 + b1)
    h2 = jax.nn.relu(h1 @ w2 + b2)
    return jax.nn.sigmoid(h2 @ w3 + b3)


if __name__ == "__main__":
    key = jax.random.PRNGKey(0)
    kx, kp = jax.random.split(key)

    # Small batch that still exercises batch padding (and the 2-step split on
    # megacore parts). x is producer-emitted bf16 (mem-bound parts benefit).
    B = 29
    x_f32 = jax.random.normal(kx, (B, 128), jnp.float32)
    x = x_f32.astype(jnp.bfloat16)
    raw_params = init_params(kp)
    kparams = prepare_params(raw_params)

    out = sonde_net_forward(x, kparams)
    out = jax.block_until_ready(out)

    # Reference uses the same bf16-quantized input so only the bf16 weight /
    # MXU error remains in the comparison.
    ref = _reference(x.astype(jnp.float32), raw_params)
    assert out.shape == (B, 1)
    assert jnp.allclose(out, ref, atol=2e-2, rtol=2e-2), (
        f"mismatch vs reference: max abs err = {jnp.max(jnp.abs(out - ref))}")

    print("KERNEL_OK")
</pallas_src>

<mosaic_0001>
module attributes {stable_mosaic.version = 11 : i64} {
  func.func @_mlp_kernel(%arg0: i32, %arg1: memref<32x128xbf16, #tpu.memory_space<vmem>>, %arg2: memref<128x256xbf16, #tpu.memory_space<vmem>>, %arg3: memref<1x256xf32, #tpu.memory_space<vmem>>, %arg4: memref<256x128xbf16, #tpu.memory_space<vmem>>, %arg5: memref<1x128xf32, #tpu.memory_space<vmem>>, %arg6: memref<1x128xf32, #tpu.memory_space<vmem>>, %arg7: memref<1x1xf32, #tpu.memory_space<smem>>, %arg8: memref<32x1xf32, #tpu.memory_space<vmem>>) attributes {dimension_semantics = [#tpu.dimension_semantics<parallel>], iteration_bounds = array<i64: 1>, scalar_prefetch = 0 : i64, scratch_operands = 0 : i64, tpu.core_type = #tpu.core_type<tc>, window_params = [{transform_indices = @transform_0, window_bounds = array<i64: 32, 128>}, {pipeline_mode = #tpu.pipeline_mode<synchronous>, transform_indices = @transform_1, window_bounds = array<i64: 128, 256>}, {pipeline_mode = #tpu.pipeline_mode<synchronous>, transform_indices = @transform_2, window_bounds = array<i64: 1, 256>}, {pipeline_mode = #tpu.pipeline_mode<synchronous>, transform_indices = @transform_3, window_bounds = array<i64: 256, 128>}, {pipeline_mode = #tpu.pipeline_mode<synchronous>, transform_indices = @transform_4, window_bounds = array<i64: 1, 128>}, {pipeline_mode = #tpu.pipeline_mode<synchronous>, transform_indices = @transform_5, window_bounds = array<i64: 1, 128>}, {transform_indices = @transform_6, window_bounds = array<i64: 1, 1>}, {transform_indices = @transform_7, window_bounds = array<i64: 32, 1>}]} {
    %c0 = arith.constant 0 : index
    %c0_0 = arith.constant 0 : index
    %0 = vector.load %arg1[%c0, %c0_0] : memref<32x128xbf16, #tpu.memory_space<vmem>>, vector<32x128xbf16>
    %c0_1 = arith.constant 0 : index
    %c0_2 = arith.constant 0 : index
    %1 = vector.load %arg2[%c0_1, %c0_2] : memref<128x256xbf16, #tpu.memory_space<vmem>>, vector<128x256xbf16>
    %cst = arith.constant dense<0.000000e+00> : vector<32x256xf32>
    %2 = tpu.matmul %0, %1, %cst {dimension_numbers = #tpu.dot_dimension_numbers<[1], [0], [0], [1], [0, 0, 1, 1], [], []>} : vector<32x128xbf16>, vector<128x256xbf16>, vector<32x256xf32> -> vector<32x256xf32>
    %c0_3 = arith.constant 0 : index
    %c0_4 = arith.constant 0 : index
    %3 = vector.load %arg3[%c0_3, %c0_4] : memref<1x256xf32, #tpu.memory_space<vmem>>, vector<1x256xf32>
    %4 = vector.broadcast %3 : vector<1x256xf32> to vector<32x256xf32>
    %5 = arith.addf %2, %4 : vector<32x256xf32>
    %cst_5 = arith.constant 0.000000e+00 : f32
    %6 = vector.broadcast %cst_5 : f32 to vector<32x256xf32>
    %7 = arith.maximumf %5, %6 : vector<32x256xf32>
    %8 = arith.truncf %7 : vector<32x256xf32> to vector<32x256xbf16>
    %c0_6 = arith.constant 0 : index
    %c0_7 = arith.constant 0 : index
    %9 = vector.load %arg4[%c0_6, %c0_7] : memref<256x128xbf16, #tpu.memory_space<vmem>>, vector<256x128xbf16>
    %cst_8 = arith.constant dense<0.000000e+00> : vector<32x128xf32>
    %10 = tpu.matmul %8, %9, %cst_8 {dimension_numbers = #tpu.dot_dimension_numbers<[1], [0], [0], [1], [0, 0, 1, 1], [], []>} : vector<32x256xbf16>, vector<256x128xbf16>, vector<32x128xf32> -> vector<32x128xf32>
    %c0_9 = arith.constant 0 : index
    %c0_10 = arith.constant 0 : index
    %11 = vector.load %arg5[%c0_9, %c0_10] : memref<1x128xf32, #tpu.memory_space<vmem>>, vector<1x128xf32>
    %12 = vector.broadcast %11 : vector<1x128xf32> to vector<32x128xf32>
    %13 = arith.addf %10, %12 : vector<32x128xf32>
    %cst_11 = arith.constant 0.000000e+00 : f32
    %14 = vector.broadcast %cst_11 : f32 to vector<32x128xf32>
    %15 = arith.maximumf %13, %14 : vector<32x128xf32>
    %c0_12 = arith.constant 0 : index
    %c0_13 = arith.constant 0 : index
    %16 = vector.load %arg6[%c0_12, %c0_13] : memref<1x128xf32, #tpu.memory_space<vmem>>, vector<1x128xf32>
    %17 = vector.broadcast %16 : vector<1x128xf32> to vector<32x128xf32>
    %18 = arith.mulf %15, %17 : vector<32x128xf32>
    %cst_14 = arith.constant dense<0.000000e+00> : vector<32xf32>
    %19 = vector.multi_reduction <add>, %18, %cst_14 [1] : vector<32x128xf32> to vector<32xf32>
    %20 = vector.shape_cast %19 : vector<32xf32> to vector<32x1xf32>
    %c0_15 = arith.constant 0 : index
    %c0_16 = arith.constant 0 : index
    %21 = memref.load %arg7[%c0_15, %c0_16] : memref<1x1xf32, #tpu.memory_space<smem>>
    %22 = vector.broadcast %21 : f32 to vector<32x1xf32>
    %23 = arith.addf %20, %22 : vector<32x1xf32>
    %cst_17 = arith.constant -3.000000e+01 : f32
    %cst_18 = arith.constant 3.000000e+01 : f32
    %24 = vector.broadcast %cst_17 : f32 to vector<32x1xf32>
    %25 = arith.maximumf %24, %23 : vector<32x1xf32>
    %26 = vector.broadcast %cst_18 : f32 to vector<32x1xf32>
    %27 = arith.minimumf %26, %25 : vector<32x1xf32>
    %cst_19 = arith.constant 0.000000e+00 : f32
    %28 = vector.broadcast %cst_19 : f32 to vector<32x1xf32>
    %29 = arith.subf %28, %27 : vector<32x1xf32>
    %30 = math.exp %29 : vector<32x1xf32>
    %cst_20 = arith.constant 1.000000e+00 : f32
    %31 = vector.broadcast %cst_20 : f32 to vector<32x1xf32>
    %32 = arith.addf %31, %30 : vector<32x1xf32>
    %cst_21 = arith.constant 1.000000e+00 : f32
    %33 = vector.broadcast %cst_21 : f32 to vector<32x1xf32>
    %34 = arith.divf %33, %32 : vector<32x1xf32>
    %c0_22 = arith.constant 0 : index
    %c0_23 = arith.constant 0 : index
    %35 = vector.load %arg8[%c0_22, %c0_23] : memref<32x1xf32, #tpu.memory_space<vmem>>, vector<32x1xf32>
    tpu.vector_store %arg8[%c0_22, %c0_23], %34 {strides = array<i32>} : memref<32x1xf32, #tpu.memory_space<vmem>>, vector<32x1xf32>,
    return
  }
  func.func @transform_0(%arg0: i32) -> (i32, i32) {
    %c0_i32 = arith.constant 0 : i32
    %c0_i32_0 = arith.constant 0 : i32
    return %arg0, %c0_i32 : i32, i32
  }
  func.func @transform_1(%arg0: i32) -> (i32, i32) {
    %c0_i32 = arith.constant 0 : i32
    %c0_i32_0 = arith.constant 0 : i32
    %c0_i32_1 = arith.constant 0 : i32
    return %c0_i32, %c0_i32_0 : i32, i32
  }
  func.func @transform_2(%arg0: i32) -> (i32, i32) {
    %c0_i32 = arith.constant 0 : i32
    %c0_i32_0 = arith.constant 0 : i32
    %c0_i32_1 = arith.constant 0 : i32
    return %c0_i32, %c0_i32_0 : i32, i32
  }
  func.func @transform_3(%arg0: i32) -> (i32, i32) {
    %c0_i32 = arith.constant 0 : i32
    %c0_i32_0 = arith.constant 0 : i32
    %c0_i32_1 = arith.constant 0 : i32
    return %c0_i32, %c0_i32_0 : i32, i32
  }
  func.func @transform_4(%arg0: i32) -> (i32, i32) {
    %c0_i32 = arith.constant 0 : i32
    %c0_i32_0 = arith.constant 0 : i32
    %c0_i32_1 = arith.constant 0 : i32
    return %c0_i32, %c0_i32_0 : i32, i32
  }
  func.func @transform_5(%arg0: i32) -> (i32, i32) {
    %c0_i32 = arith.constant 0 : i32
    %c0_i32_0 = arith.constant 0 : i32
    %c0_i32_1 = arith.constant 0 : i32
    return %c0_i32, %c0_i32_0 : i32, i32
  }
  func.func @transform_6(%arg0: i32) -> (i32, i32) {
    %c0_i32 = arith.constant 0 : i32
    %c0_i32_0 = arith.constant 0 : i32
    %c0_i32_1 = arith.constant 0 : i32
    return %c0_i32, %c0_i32_0 : i32, i32
  }
  func.func @transform_7(%arg0: i32) -> (i32, i32) {
    %c0_i32 = arith.constant 0 : i32
    %c0_i32_0 = arith.constant 0 : i32
    return %arg0, %c0_i32 : i32, i32
  }
}

</mosaic_0001>

<bundles_post_ra>
// kernel: tpu_custom_call.1
= control target key start
LH: loop header
LB: loop body
LE: loop exit
PB: predicated region body
PF: predicated region fallthrough
CT: control target
= control target key end

     0   :  { %13 = vsyncpa [#allocation4], 0  ;;  %s826_s0 = inlined_call_operand.hbm [shape: bf16[32,128], index: 0, kind: input, shape index: {}]   ;;  %s827_s1 = inlined_call_operand.hbm [shape: bf16[128,256], index: 1, kind: input, shape index: {}]   ;;  %s828_s2 = inlined_call_operand.vmem [shape: f32[1,256], index: 2, kind: input, shape index: {}]   ;;  %s829_s3 = inlined_call_operand.hbm [shape: bf16[256,128], index: 3, kind: input, shape index: {}]   ;;  %s830_s4 = inlined_call_operand.vmem [shape: f32[1,128], index: 4, kind: input, shape index: {}]   ;;  %s831_s5 = inlined_call_operand.vmem [shape: f32[1,128], index: 5, kind: input, shape index: {}]   ;;  %s832_s6 = inlined_call_operand.<no memory space> [shape: f32[1,1], index: 6, kind: input, shape index: {}]   ;;  %s833_s7 = inlined_call_operand.vmem [shape: f32[32,1], index: 7, kind: output, shape index: {}]  }
   0x1   :  { %14 = vsyncpa [#allocation6], 0  ;;  %s718_s24 = smov [#allocation5]   ;;  %s648_s28 = scalar_lea.hbm %s827_s1, 2048 }
   0x2   :  { %s32_s25 = sshll.u32 %s718_s24, 4  ;;  %p649_p0 = scmp.ne.s32.totalorder %s827_s1, %s648_s28  ;;  %s33_s25 = int_to_ptr.vmem [resolvable:$true] %s32_s25 }
   0x3   :  { %p652_p1 = scmp.lt.u32.totalorder %s648_s28, %s827_s1 }
   0x5   :  { %p654_p2 = pnand %p652_p1, %p649_p0 }
   0x7   :  { %657 = shalt.err (!%p654_p2)
}
   0x8   :  { %s658_s10 = scalar_lea.vmem %s33_s25, 2048  ;;  %p663_p4 = scmp.lt.s32.totalorder %s33_s25, %s33_s25 }
   0x9   :  { %p659_p3 = scmp.ne.s32.totalorder %s33_s25, %s658_s10  ;;  %p664_p5 = scmp.lt.s32.totalorder %s658_s10, %s658_s10 }
   0xb   :  { %p665_p6 = por %p664_p5, %p663_p4 }
   0xd   :  { %p666_p7 = pnand %p665_p6, %p659_p3 }
   0xf   :  { %669 = shalt.err (!%p666_p7)
}
  0x10   :  { %s719_s11 = smov 128   ;;  %s720_s12 = smov 8  }
  0x11   :  { %38 = dma.hbm_to_vmem [thread:$0]  %s827_s1, 2048, %s33_s25, [#allocation6], %s719_s11, %s719_s11, %s720_s12  }
  0x12   :  { %s721_s15 = smov [#allocation3]   ;;  %s670_s19 = scalar_lea.hbm %s826_s0, 256 }
  0x13   :  { %s20_s16 = sshll.u32 %s721_s15, 4  ;;  %p671_p8 = scmp.ne.s32.totalorder %s826_s0, %s670_s19  ;;  %s21_s16 = int_to_ptr.vmem [resolvable:$true] %s20_s16 }
  0x14   :  { %p674_p9 = scmp.lt.u32.totalorder %s670_s19, %s826_s0 }
  0x16   :  { %p676_p10 = pnand %p674_p9, %p671_p8 }
  0x18   :  { %679 = shalt.err (!%p676_p10)
}
  0x19   :  { %s680_s24 = scalar_lea.vmem %s21_s16, 256  ;;  %p685_p12 = scmp.lt.s32.totalorder %s21_s16, %s21_s16 }
  0x1a   :  { %p681_p11 = scmp.ne.s32.totalorder %s21_s16, %s680_s24  ;;  %p686_p13 = scmp.lt.s32.totalorder %s680_s24, %s680_s24 }
  0x1c   :  { %p687_p0 = por %p686_p13, %p685_p12 }
  0x1e   :  { %p688_p1 = pnand %p687_p0, %p681_p11 }
  0x20   :  { %691 = shalt.err (!%p688_p1)
}
  0x21   :  { %s722_s1 = smov 64   ;;  %s723_s25 = smov 4  }
  0x22   :  { %26 = dma.hbm_to_vmem [thread:$0]  %s826_s0, 256, %s21_s16, [#allocation4], %s722_s1, %s722_s1, %s723_s25  }
  0x23   :  { %s724_s28 = smov [#allocation7]   ;;  %s692_s9 = scalar_lea.hbm %s829_s3, 2048 }
  0x24   :  { %s46_s29 = sshll.u32 %s724_s28, 4  ;;  %p693_p2 = scmp.ne.s32.totalorder %s829_s3, %s692_s9  ;;  %s47_s29 = int_to_ptr.vmem [resolvable:$true] %s46_s29 }
  0x25   :  { %p696_p3 = scmp.lt.u32.totalorder %s692_s9, %s829_s3 }
  0x27   :  { %p698_p4 = pnand %p696_p3, %p693_p2 }
  0x29   :  { %701 = shalt.err (!%p698_p4)
}
  0x2a   :  { %s702_s14 = scalar_lea.vmem %s47_s29, 2048  ;;  %p707_p6 = scmp.lt.s32.totalorder %s47_s29, %s47_s29 }
  0x2b   :  { %p703_p5 = scmp.ne.s32.totalorder %s47_s29, %s702_s14  ;;  %p708_p7 = scmp.lt.s32.totalorder %s702_s14, %s702_s14 }
  0x2d   :  { %p709_p8 = por %p708_p7, %p707_p6 }
  0x2f   :  { %p710_p9 = pnand %p709_p8, %p703_p5 }
  0x31   :  { %713 = shalt.err (!%p710_p9)
}
  0x32   :  { %52 = dma.hbm_to_vmem [thread:$0]  %s829_s3, 2048, %s47_s29, [#allocation6], %s722_s1, %s722_s1, %s723_s25  }
  0x33   :  { %714 = dma.done.wait [#allocation4], 256  }
  0x34   :  { %715 = vsyncadd [#allocation4], 4294967040 }
  0x35   :  { %716 = dma.done.wait [#allocation6], 4096  }
  0x36   :  { %717 = vsyncadd [#allocation6], 4294963200  ;;  %v725_v0 = vmov 0   ;;  %v590_v1 = vld [vmem:[#allocation5 + $0x4] ss:$8 sps:$4 sm:$0xff]   ;;  %v620_v16 = vld [vmem:[#allocation7 + $0x50] sm:$0xff]   ;;  %v91_v35 = vlaneseq }
  0x37   :  { %225 = vmatprep.mubr.bf16.mxu0 %v725_v0  ;;  %v592_v2 = vld [vmem:[#allocation5] ss:$8 sps:$4 sm:$0xff]   ;;  %193 = vmatprep.subr.bf16.mxu0 %v590_v1  ;;  %v593_v3 = vld [vmem:[#allocation5 + $0x14] ss:$8 sps:$4 sm:$0xff]   ;;  %v595_v4 = vld [vmem:[#allocation5 + $0x10] ss:$8 sps:$4 sm:$0xff]  }
  0x38   :  { %194 = vmatpush1.bf16.msra.mxu0 %v592_v2  ;;  %v596_v5 = vld [vmem:[#allocation5 + $0x24] ss:$8 sps:$4 sm:$0xff]   ;;  %v598_v6 = vld [vmem:[#allocation5 + $0x20] ss:$8 sps:$4 sm:$0xff]   ;;  %v599_v7 = vld [vmem:[#allocation5 + $0x34] ss:$8 sps:$4 sm:$0xff]  }
  0x39   :  { %195 = vmatprep.subr.bf16.mxu0 %v593_v3  ;;  %v601_v8 = vld [vmem:[#allocation5 + $0x30] ss:$8 sps:$4 sm:$0xff]   ;;  %v602_v9 = vld [vmem:[#allocation5 + $0x44] ss:$8 sps:$4 sm:$0xff]   ;;  %v604_v10 = vld [vmem:[#allocation5 + $0x40] ss:$8 sps:$4 sm:$0xff]  }
  0x3a   :  { %v616_v11 = vld [vmem:[#allocation7 + $0x40] sm:$0xff]   ;;  %v605_v12 = vld [vmem:[#allocation5 + $0x54] ss:$8 sps:$4 sm:$0xff]   ;;  %v618_v14 = vld [vmem:[#allocation7 + $0x48] sm:$0xff]   ;;  %v92_v36 = vshrl.u32 %v91_v35, 7  ;;  %vm503_vm0 = vcmask 7168  }
  0x3b   :  { %v617_v13 = vld [vmem:[#allocation7] sm:$0xff]   ;;  %554 = vmatprep.subr.bf16.mxu1 %v616_v11  ;;  %v619_v15 = vld [vmem:[#allocation7 + $0x8] sm:$0xff]   ;;  %v607_v17 = vld [vmem:[#allocation5 + $0x50] ss:$8 sps:$4 sm:$0xff]  }
  0x3c   :  { %196 = vmatpush1.bf16.msra.mxu0 %v595_v4  ;;  %555 = vmatpush3.bf16.msra.mxu1 %v617_v13  ;;  %v608_v18 = vld [vmem:[#allocation5 + $0x64] ss:$8 sps:$4 sm:$0xff]   ;;  %v621_v19 = vld [vmem:[#allocation7 + $0x10] sm:$0xff]   ;;  %v610_v20 = vld [vmem:[#allocation5 + $0x60] ss:$8 sps:$4 sm:$0xff]   ;;  %v93_v37 = vsub.s32 0, %v92_v36 }
  0x3d   :  { %197 = vmatprep.subr.bf16.mxu0 %v596_v5  ;;  %556 = vmatprep.subr.bf16.mxu1 %v618_v14  ;;  %v622_v21 = vld [vmem:[#allocation7 + $0x58] sm:$0xff]   ;;  %v624_v24 = vld [vmem:[#allocation7 + $0x60] sm:$0xff]   ;;  %v626_v27 = vld [vmem:[#allocation7 + $0x68] sm:$0xff]   ;;  %v97_v39 = vsub.s32 1, %v92_v36 }
  0x3e   :  { %v611_v22 = vld [vmem:[#allocation5 + $0x74] ss:$8 sps:$4 sm:$0xff]   ;;  %v613_v25 = vld [vmem:[#allocation5 + $0x70] ss:$8 sps:$4 sm:$0xff]   ;;  %v625_v26 = vld [vmem:[#allocation7 + $0x20] sm:$0xff]  }
  0x3f   :  { %v623_v23 = vld [vmem:[#allocation7 + $0x18] sm:$0xff]   ;;  %v614_v28 = vld [vmem:[#allocation3] sm:$0xff]   ;;  %v627_v30 = vld [vmem:[#allocation7 + $0x28] sm:$0xff]  }
  0x40   :  { %198 = vmatpush1.bf16.msra.mxu0 %v598_v6  ;;  %557 = vmatpush3.bf16.msra.mxu1 %v619_v15  ;;  %v615_v29 = vld [vmem:[#allocation3 + $0x8] sm:$0xff]   ;;  %v628_v31 = vld [vmem:[#allocation7 + $0x70] sm:$0xff]  }
  0x41   :  { %199 = vmatprep.subr.bf16.mxu0 %v599_v7  ;;  %558 = vmatprep.subr.bf16.mxu1 %v620_v16  ;;  %v629_v32 = vld [vmem:[#allocation7 + $0x30] sm:$0xff]   ;;  %v630_v33 = vld [vmem:[#allocation7 + $0x78] sm:$0xff]  }
  0x42   :  { %v631_v34 = vld [vmem:[#allocation7 + $0x38] sm:$0xff]   ;;  %v89_v38 = vld [vmem:[%s828_s2] sm:$0x3] }
  0x43   :  { %v94_v40 = vrot.slane %v89_v38, %v93_v37  ;;  %v98_v41 = vrot.slane %v89_v38, %v97_v39  ;;  %v549_v14 = vld [vmem:[%s831_s5] ss:$0 sm:$0xff] }
  0x44   :  { %200 = vmatpush1.bf16.msra.mxu0 %v601_v8  ;;  %559 = vmatpush3.bf16.msra.mxu1 %v621_v19  ;;  %v532_v8 = vld [vmem:[%s830_s4] ss:$0 sm:$0xff] }
  0x45   :  { %201 = vmatprep.subr.bf16.mxu0 %v602_v9  ;;  %560 = vmatprep.subr.bf16.mxu1 %v622_v21 }
  0x48   :  { %202 = vmatpush1.bf16.msra.mxu0 %v604_v10  ;;  %561 = vmatpush3.bf16.msra.mxu1 %v623_v23 }
  0x49   :  { %203 = vmatprep.subr.bf16.mxu0 %v605_v12  ;;  %562 = vmatprep.subr.bf16.mxu1 %v624_v24 }
  0x4c   :  { %204 = vmatpush1.bf16.msra.mxu0 %v607_v17  ;;  %563 = vmatpush3.bf16.msra.mxu1 %v625_v26 }
  0x4d   :  { %205 = vmatprep.subr.bf16.mxu0 %v608_v18  ;;  %564 = vmatprep.subr.bf16.mxu1 %v626_v27 }
  0x50   :  { %206 = vmatpush1.bf16.msra.mxu0 %v610_v20  ;;  %565 = vmatpush3.bf16.msra.mxu1 %v627_v30 }
  0x51   :  { %207 = vmatprep.subr.bf16.mxu0 %v611_v22  ;;  %566 = vmatprep.subr.bf16.mxu1 %v628_v31 }
  0x54   :  { %208 = vmatpush1.bf16.msra.mxu0 %v613_v25  ;;  %567 = vmatpush3.bf16.msra.mxu1 %v629_v32  ;;  %v466_v32 = vstv %s832_s6 }
  0x55   :  { %568 = vmatprep.subr.bf16.mxu1 %v630_v33 }
  0x57   :  { %226 = vmatmul.mubr.bf16.vlgmr.msra.gmra.mrb[0].mxu0 %v614_v28 }
  0x58   :  { %235 = vmatprep.mubr.bf16.mxu0 %v725_v0  ;;  %569 = vmatpush3.bf16.msra.mxu1 %v631_v34 }
  0x5f   :  { %236 = vmatmul.mubr.bf16.gmra.mrb[4].mxu0 %v615_v29 }
 0x12a   :  { %v227_v42 = vpop.f32.mrb[0].mxu0 }
 0x12b   :  { %v228_v43 = vadd.f32 %v227_v42, %v94_v40  ;;  %v229_v44 = vpop.f32.mrb[1].mxu0 }
 0x12c   :  { %v230_v45 = vadd.f32 %v229_v44, %v98_v41  ;;  %v231_v46 = vpop.f32.mrb[2].mxu0 }
 0x12d   :  { %v232_v47 = vadd.f32 %v231_v46, %v94_v40  ;;  %v233_v48 = vpop.f32.mrb[3].mxu0  ;;  %v246_v50 = vmax.f32 %v228_v43, 0.0 }
 0x12e   :  { %v234_v49 = vadd.f32 %v233_v48, %v98_v41  ;;  %v247_v52 = vmax.f32 %v230_v45, 0.0 }
 0x12f   :  { %v248_v51 = vmax.f32 %v232_v47, 0.0 }
 0x130   :  { %v249_v53 = vmax.f32 %v234_v49, 0.0 }
 0x131   :  { %v254_v54 = vpack.c.bf16 %v248_v51, %v246_v50 }
 0x132   :  { %v237_v55 = vpop.f32.mrb[4].mxu0  ;;  %v255_v56 = vpack.c.bf16 %v249_v53, %v247_v52 }
 0x133   :  { %v238_v57 = vadd.f32 %v237_v55, %v94_v40  ;;  %v239_v58 = vpop.f32.mrb[5].mxu0 }
 0x134   :  { %v240_v59 = vadd.f32 %v239_v58, %v98_v41  ;;  %v241_v60 = vpop.f32.mrb[6].mxu0  ;;  %425 = vmatprep.mubr.bf16.mxu1 %v255_v56 }
 0x135   :  { %v242_v61 = vadd.f32 %v241_v60, %v94_v40  ;;  %v243_v62 = vpop.f32.mrb[7].mxu0  ;;  %426 = vmatmul.mubr.bf16.vlgmr.msra.gmra.mrb[0].mxu1 %v254_v54  ;;  %v250_v0 = vmax.f32 %v238_v57, 0.0 }
 0x136   :  { %v244_v63 = vadd.f32 %v243_v62, %v98_v41  ;;  %v251_v2 = vmax.f32 %v240_v59, 0.0 }
 0x137   :  { %v252_v1 = vmax.f32 %v242_v61, 0.0 }
 0x138   :  { %v253_v3 = vmax.f32 %v244_v63, 0.0 }
 0x139   :  { %v256_v4 = vpack.c.bf16 %v252_v1, %v250_v0 }
 0x13a   :  { %v257_v5 = vpack.c.bf16 %v253_v3, %v251_v2 }
 0x13c   :  { %433 = vmatprep.mubr.bf16.mxu1 %v257_v5 }
 0x13d   :  { %434 = vmatmul.mubr.bf16.gmra.mrb[4].mxu1 %v256_v4 }
 0x208   :  { %v570_v6 = vpop.f32.mrb[0].mxu1 }
 0x209   :  { %v571_v7 = vpop.f32.mrb[1].mxu1 }
 0x20a   :  { %v572_v9 = vadd.f32 %v571_v7, %v570_v6  ;;  %v573_v10 = vpop.f32.mrb[2].mxu1 }
 0x20b   :  { %v574_v11 = vpop.f32.mrb[3].mxu1 }
 0x20c   :  { %v575_v12 = vadd.f32 %v574_v11, %v573_v10  ;;  %v428_v13 = vadd.f32 %v572_v9, %v532_v8 }
 0x20e   :  { %v431_v15 = vadd.f32 %v575_v12, %v532_v8  ;;  %v442_v16 = vmax.f32 %v428_v13, 0.0 }
 0x210   :  { %v443_v17 = vmax.f32 %v431_v15, 0.0  ;;  %v576_v18 = vpop.f32.mrb[4].mxu1  ;;  %v453_v19 = vmul.f32 %v549_v14, %v442_v16 }
 0x211   :  { %v577_v20 = vpop.f32.mrb[5].mxu1 }
 0x212   :  { %v578_v21 = vadd.f32 %v577_v20, %v576_v18  ;;  %v579_v22 = vpop.f32.mrb[6].mxu1  ;;  %457 = vadd.xlane.f32.xlu0 %v453_v19  ;;  %v454_v25 = vmul.f32 %v549_v14, %v443_v17 }
 0x213   :  { %v580_v23 = vpop.f32.mrb[7].mxu1 }
 0x214   :  { %v581_v24 = vadd.f32 %v580_v23, %v579_v22  ;;  %v436_v26 = vadd.f32 %v578_v21, %v532_v8 }
 0x216   :  { %v439_v27 = vadd.f32 %v581_v24, %v532_v8  ;;  %459 = vadd.xlane.f32.xlu0 %v454_v25  ;;  %v444_v28 = vmax.f32 %v436_v26, 0.0 }
 0x218   :  { %v445_v29 = vmax.f32 %v439_v27, 0.0  ;;  %v455_v30 = vmul.f32 %v549_v14, %v444_v28 }
 0x21a   :  { %461 = vadd.xlane.f32.xlu1 %v455_v30  ;;  %v456_v31 = vmul.f32 %v549_v14, %v445_v29 }
 0x21e   :  { %463 = vadd.xlane.f32.xlu1 %v456_v31 }
 0x29f   :  { %v458_v33 = vpop.xlane.xlu0 %457 }
 0x2a0   :  { %v467_v34 = vadd.f32 %v466_v32, %v458_v33 }
 0x2a2   :  { %v550_v35 = vclamps-f32 %v467_v34, 30.0 }
 0x2a3   :  { %v460_v36 = vpop.xlane.xlu0 %459 }
 0x2a4   :  { %v479_v37 = vsub.f32 0.0, %v550_v35  ;;  %v468_v38 = vadd.f32 %v466_v32, %v460_v36 }
 0x2a6   :  { %v483_v39 = vmul.f32 1.442695, %v479_v37  ;;  %v551_v40 = vclamps-f32 %v468_v38, 30.0 }
 0x2a7   :  { %v462_v41 = vpop.xlane.xlu1 %461 }
 0x2a8   :  { %632 = vpow2.f32 %v483_v39  ;;  %v480_v42 = vsub.f32 0.0, %v551_v40  ;;  %v469_v43 = vadd.f32 %v466_v32, %v462_v41 }
 0x2aa   :  { %v485_v44 = vmul.f32 1.442695, %v480_v42  ;;  %v552_v45 = vclamps-f32 %v469_v43, 30.0 }
 0x2ab   :  { %v464_v46 = vpop.xlane.xlu1 %463 }
 0x2ac   :  { %634 = vpow2.f32 %v485_v44  ;;  %v481_v47 = vsub.f32 0.0, %v552_v45  ;;  %v470_v48 = vadd.f32 %v466_v32, %v464_v46 }
 0x2ae   :  { %v487_v49 = vmul.f32 1.442695, %v481_v47  ;;  %v553_v50 = vclamps-f32 %v470_v48, 30.0 }
 0x2b0   :  { %636 = vpow2.f32 %v487_v49  ;;  %v482_v51 = vsub.f32 0.0, %v553_v50 }
 0x2b2   :  { %v633_v52 = vpop.eup %632  ;;  %v489_v53 = vmul.f32 1.442695, %v482_v51 }
 0x2b3   :  { %v491_v54 = vadd.f32 1.0, %v633_v52 }
 0x2b4   :  { %638 = vpow2.f32 %v489_v53 }
 0x2b5   :  { %640 = vrcp.f32 %v491_v54 }
 0x2b6   :  { %v635_v55 = vpop.eup %634 }
 0x2b7   :  { %v492_v56 = vadd.f32 1.0, %v635_v55 }
 0x2b9   :  { %642 = vrcp.f32 %v492_v56 }
 0x2ba   :  { %v637_v57 = vpop.eup %636 }
 0x2bb   :  { %v493_v58 = vadd.f32 1.0, %v637_v57 }
 0x2bd   :  { %644 = vrcp.f32 %v493_v58 }
 0x2be   :  { %v639_v59 = vpop.eup %638 }
 0x2bf   :  { %v641_v60 = vpop.eup %640  ;;  %v494_v61 = vadd.f32 1.0, %v639_v59 }
 0x2c0   :  { %504 = vst.msk [vmem:[%s833_s7] sm:$0xff] %vm503_vm0, %v641_v60 }
 0x2c1   :  { %646 = vrcp.f32 %v494_v61 }
 0x2c3   :  { %v643_v62 = vpop.eup %642 }
 0x2c4   :  { %505 = vst.msk [vmem:[%s833_s7 + $0x8] sm:$0xff] %vm503_vm0, %v643_v62 }
 0x2c7   :  { %v645_v63 = vpop.eup %644 }
 0x2c8   :  { %506 = vst.msk [vmem:[%s833_s7 + $0x10] sm:$0xff] %vm503_vm0, %v645_v63 }
 0x2cb   :  { %v647_v0 = vpop.eup %646 }
 0x2cc   :  { %507 = vst.msk [vmem:[%s833_s7 + $0x18] sm:$0xff] %vm503_vm0, %v647_v0 }
 0x2cd   :  { %512 = vsyncpa [#allocation4], 1 }
 0x2ce   :  { %513 = vsyncpa [#allocation6], 1 }

</bundles_post_ra>
